<compile_context>
chip_gen: v7x
topology: tpu7x:2x2x1
jax: 0.10.0
libtpu: 0.0.40
codegen_flags: <defaults>
</compile_context>

<pallas_src>
import jax
import jax.numpy as jnp
from jax.experimental import pallas as pl
from jax.experimental.pallas import tpu as pltpu

BN_EPS = 1e-5
N_CLASSES = 10
N_OUT_PAD = 128          # lane-dense padded output width (multiple of 128)
NEG_PAD = -1e30          # finite "minus infinity" for padded logit lanes
TILE_B_MAX = 1024        # fits easily in scoped VMEM with double-buffering


def _round_up(x, m):
    return ((x + m - 1) // m) * m


# ----------------------------------------------------------------------------
# Kernel: (dot + bias + ReLU) x2, dot + bias, log_softmax — all fused.
# ----------------------------------------------------------------------------
def _binarized_mlp_kernel(
    x_ref,            # (TILE_B, 784)  bf16
    w1_ref, b1_ref,   # (784, 64) bf16, (1, 64) f32
    w2_ref, b2_ref,   # (64, 32)  f32  (BN1 folded into sign(W2)), (1, 32) f32
    w3_ref, b3_ref,   # (32, 128) f32  (BN2 folded, lane-padded), (1, 128) f32
    o_ref,            # (TILE_B, 128) f32
):
    # ---- Linear(784, 64) + ReLU (bf16 MXU, f32 accumulation) ----
    h1 = jnp.dot(x_ref[...], w1_ref[...],
                 preferred_element_type=jnp.float32) + b1_ref[...]
    h1 = jnp.maximum(h1, 0.0)

    # ---- BN1-folded binarized QLinear(64, 32) + ReLU ----
    h2 = jnp.dot(h1, w2_ref[...],
                 preferred_element_type=jnp.float32) + b2_ref[...]
    h2 = jnp.maximum(h2, 0.0)

    # ---- BN2-folded Linear(32, 10 -> 128 padded) ----
    logits = jnp.dot(h2, w3_ref[...],
                     preferred_element_type=jnp.float32) + b3_ref[...]

    # ---- log_softmax along dim=1 (padded lanes: exp(-1e30 - mx) == 0) ----
    mx = jnp.max(logits, axis=-1, keepdims=True)
    z = logits - mx
    lse = jnp.log(jnp.sum(jnp.exp(z), axis=-1, keepdims=True))
    o_ref[...] = z - lse


# ----------------------------------------------------------------------------
# Parameter folding (one-time, outside the kernel body)
# ----------------------------------------------------------------------------
def fold_params(params):
    f32 = jnp.float32

    # TODO(synk): exact qnn.QLinear quantizer unknown; using sign(W) with 0 -> +1.
    w2_bin = jnp.where(params["w2"] >= 0.0, 1.0, -1.0).astype(f32)

    # Fold BatchNorm1d(64) into the binarized matmul.
    s1 = params["g1"] * jax.lax.rsqrt(params["v1"] + BN_EPS)      # (1, 64)
    t1 = params["be1"] - params["m1"] * s1                        # (1, 64)
    w2f = s1.reshape(-1, 1) * w2_bin                              # (64, 32)
    b2f = t1 @ w2_bin                                             # (1, 32)

    # Fold BatchNorm1d(32) into the final Linear.
    s2 = params["g2"] * jax.lax.rsqrt(params["v2"] + BN_EPS)      # (1, 32)
    t2 = params["be2"] - params["m2"] * s2                        # (1, 32)
    w3f = s2.reshape(-1, 1) * params["w3"]                        # (32, 10)
    b3f = t2 @ params["w3"] + params["b3"]                        # (1, 10)

    # Lane-dense padding of the output head: 10 -> 128 columns.
    w3p = jnp.zeros((w3f.shape[0], N_OUT_PAD), f32).at[:, :N_CLASSES].set(w3f)
    b3p = jnp.full((1, N_OUT_PAD), NEG_PAD, f32).at[:, :N_CLASSES].set(b3f)

    return {
        "w1": params["w1"].astype(jnp.bfloat16),
        "b1": params["b1"].astype(f32),
        "w2": w2f, "b2": b2f,
        "w3": w3p, "b3": b3p,
    }


# ----------------------------------------------------------------------------
# Wrapper
# ----------------------------------------------------------------------------
@jax.jit
def binarized_mlp_forward(x_nchw, params):
    """x_nchw: (B, 1, 28, 28) float32. Returns (B, 10) log-probabilities."""
    B = x_nchw.shape[0]
    fp = fold_params(params)

    x = x_nchw.reshape(B, -1).astype(jnp.bfloat16)        # Flatten -> (B, 784)
    d_in = x.shape[1]

    tile_b = min(TILE_B_MAX, _round_up(B, 8))
    b_pad = _round_up(B, tile_b)
    if b_pad != B:
        x = jnp.pad(x, ((0, b_pad - B), (0, 0)))

    def full_spec(arr):
        return pl.BlockSpec(arr.shape, lambda i: (0, 0))

    flops = 2 * b_pad * (d_in * 64 + 64 * 32 + 32 * N_OUT_PAD)
    bytes_accessed = (b_pad * d_in * 2 + b_pad * N_OUT_PAD * 4
                      + d_in * 64 * 2 + (64 * 32 + 32 * N_OUT_PAD) * 4)

    out = pl.pallas_call(
        _binarized_mlp_kernel,
        out_shape=jax.ShapeDtypeStruct((b_pad, N_OUT_PAD), jnp.float32),
        grid=(b_pad // tile_b,),
        in_specs=[
            pl.BlockSpec((tile_b, d_in), lambda i: (i, 0)),   # x tile per step
            full_spec(fp["w1"]), full_spec(fp["b1"]),
            full_spec(fp["w2"]), full_spec(fp["b2"]),
            full_spec(fp["w3"]), full_spec(fp["b3"]),
        ],
        out_specs=pl.BlockSpec((tile_b, N_OUT_PAD), lambda i: (i, 0)),
        compiler_params=pltpu.CompilerParams(
            dimension_semantics=("parallel",)),
        cost_estimate=pl.CostEstimate(
            flops=flops,
            transcendentals=b_pad * N_OUT_PAD,
            bytes_accessed=bytes_accessed),
    )(x, fp["w1"], fp["b1"], fp["w2"], fp["b2"], fp["w3"], fp["b3"])

    return out[:B, :N_CLASSES]


# ----------------------------------------------------------------------------
# Pure-JAX reference (mirrors the PyTorch module; bf16 only on the 1st matmul
# to match the kernel's deliberate cast)
# ----------------------------------------------------------------------------
def reference_forward(x_nchw, params):
    B = x_nchw.shape[0]
    x = x_nchw.reshape(B, -1)
    h1 = jnp.dot(x.astype(jnp.bfloat16), params["w1"].astype(jnp.bfloat16),
                 preferred_element_type=jnp.float32) + params["b1"]
    h1 = jnp.maximum(h1, 0.0)
    h1 = ((h1 - params["m1"]) * jax.lax.rsqrt(params["v1"] + BN_EPS)
          * params["g1"] + params["be1"])
    w2_bin = jnp.where(params["w2"] >= 0.0, 1.0, -1.0)
    h2 = jnp.maximum(h1 @ w2_bin, 0.0)
    h2 = ((h2 - params["m2"]) * jax.lax.rsqrt(params["v2"] + BN_EPS)
          * params["g2"] + params["be2"])
    logits = h2 @ params["w3"] + params["b3"]
    return jax.nn.log_softmax(logits, axis=-1)


def init_params(key):
    ks = jax.random.split(key, 8)
    f32 = jnp.float32

    def row(v):  # store per-feature vectors as (1, F) for broadcasting
        return v.reshape(1, -1).astype(f32)

    params = {
        # Linear(784, 64)
        "w1": (jax.random.normal(ks[0], (784, 64)) * 0.05).astype(f32),
        "b1": row(jax.random.normal(ks[1], (64,)) * 0.01),
        # BatchNorm1d(64) (inference stats)
        "g1": row(jnp.ones((64,)) + 0.1 * jax.random.normal(ks[2], (64,))),
        "be1": row(0.1 * jax.random.normal(ks[3], (64,))),
        "m1": row(0.05 * jax.random.normal(ks[2], (64,))),
        "v1": row(jax.random.uniform(ks[3], (64,), minval=0.5, maxval=1.5)),
        # QLinear(64, 32, bias=False)
        "w2": (jax.random.normal(ks[4], (64, 32)) * 0.1).astype(f32),
        # BatchNorm1d(32)
        "g2": row(jnp.ones((32,)) + 0.1 * jax.random.normal(ks[5], (32,))),
        "be2": row(0.1 * jax.random.normal(ks[6], (32,))),
        "m2": row(0.05 * jax.random.normal(ks[5], (32,))),
        "v2": row(jax.random.uniform(ks[6], (32,), minval=0.5, maxval=1.5)),
        # Linear(32, 10)
        "w3": (jax.random.normal(ks[7], (32, 10)) * 0.1).astype(f32),
        "b3": row(0.01 * jax.random.normal(ks[7], (10,))),
    }
    return params


if __name__ == "__main__":
    key = jax.random.PRNGKey(0)
    k_x, k_p = jax.random.split(key)

    B = 8
    x = jax.random.normal(k_x, (B, 1, 28, 28), dtype=jnp.float32)  # NCHW MNIST
    params = init_params(k_p)

    out = jax.block_until_ready(binarized_mlp_forward(x, params))

    assert out.shape == (B, 10)
    # log_softmax rows should exponentiate-sum to 1
    row_sums = jnp.sum(jnp.exp(out), axis=1)
    assert bool(jnp.all(jnp.abs(row_sums - 1.0) < 1e-4))
    # match the un-folded reference (BN folding + MXU reassociation only)
    ref = reference_forward(x, params)
    assert bool(jnp.allclose(out, ref, atol=3e-2, rtol=3e-2))

    print("KERNEL_OK")
</pallas_src>

<mosaic_0001>
module attributes {stable_mosaic.version = 11 : i64} {
  func.func @_binarized_mlp_kernel(%arg0: i32, %arg1: memref<8x784xbf16, #tpu.memory_space<vmem>>, %arg2: memref<784x64xbf16, #tpu.memory_space<vmem>>, %arg3: memref<1x64xf32, #tpu.memory_space<vmem>>, %arg4: memref<64x32xf32, #tpu.memory_space<vmem>>, %arg5: memref<1x32xf32, #tpu.memory_space<vmem>>, %arg6: memref<32x128xf32, #tpu.memory_space<vmem>>, %arg7: memref<1x128xf32, #tpu.memory_space<vmem>>, %arg8: memref<8x128xf32, #tpu.memory_space<vmem>>) attributes {dimension_semantics = [#tpu.dimension_semantics<parallel>], iteration_bounds = array<i64: 1>, scalar_prefetch = 0 : i64, scratch_operands = 0 : i64, tpu.core_type = #tpu.core_type<tc>, window_params = [{transform_indices = @transform_0, window_bounds = array<i64: 8, 784>}, {pipeline_mode = #tpu.pipeline_mode<synchronous>, transform_indices = @transform_1, window_bounds = array<i64: 784, 64>}, {pipeline_mode = #tpu.pipeline_mode<synchronous>, transform_indices = @transform_2, window_bounds = array<i64: 1, 64>}, {pipeline_mode = #tpu.pipeline_mode<synchronous>, transform_indices = @transform_3, window_bounds = array<i64: 64, 32>}, {pipeline_mode = #tpu.pipeline_mode<synchronous>, transform_indices = @transform_4, window_bounds = array<i64: 1, 32>}, {pipeline_mode = #tpu.pipeline_mode<synchronous>, transform_indices = @transform_5, window_bounds = array<i64: 32, 128>}, {pipeline_mode = #tpu.pipeline_mode<synchronous>, transform_indices = @transform_6, window_bounds = array<i64: 1, 128>}, {transform_indices = @transform_7, window_bounds = array<i64: 8, 128>}]} {
    %c0 = arith.constant 0 : index
    %c0_0 = arith.constant 0 : index
    %0 = vector.load %arg1[%c0, %c0_0] : memref<8x784xbf16, #tpu.memory_space<vmem>>, vector<8x784xbf16>
    %c0_1 = arith.constant 0 : index
    %c0_2 = arith.constant 0 : index
    %1 = vector.load %arg2[%c0_1, %c0_2] : memref<784x64xbf16, #tpu.memory_space<vmem>>, vector<784x64xbf16>
    %cst = arith.constant dense<0.000000e+00> : vector<8x64xf32>
    %2 = tpu.matmul %0, %1, %cst {dimension_numbers = #tpu.dot_dimension_numbers<[1], [0], [0], [1], [0, 0, 1, 1], [], []>} : vector<8x784xbf16>, vector<784x64xbf16>, vector<8x64xf32> -> vector<8x64xf32>
    %c0_3 = arith.constant 0 : index
    %c0_4 = arith.constant 0 : index
    %3 = vector.load %arg3[%c0_3, %c0_4] : memref<1x64xf32, #tpu.memory_space<vmem>>, vector<1x64xf32>
    %4 = vector.broadcast %3 : vector<1x64xf32> to vector<8x64xf32>
    %5 = arith.addf %2, %4 : vector<8x64xf32>
    %cst_5 = arith.constant 0.000000e+00 : f32
    %6 = vector.broadcast %cst_5 : f32 to vector<8x64xf32>
    %7 = arith.maximumf %5, %6 : vector<8x64xf32>
    %c0_6 = arith.constant 0 : index
    %c0_7 = arith.constant 0 : index
    %8 = vector.load %arg4[%c0_6, %c0_7] : memref<64x32xf32, #tpu.memory_space<vmem>>, vector<64x32xf32>
    %cst_8 = arith.constant dense<0.000000e+00> : vector<8x32xf32>
    %9 = tpu.matmul %7, %8, %cst_8 {dimension_numbers = #tpu.dot_dimension_numbers<[1], [0], [0], [1], [0, 0, 1, 1], [], []>} : vector<8x64xf32>, vector<64x32xf32>, vector<8x32xf32> -> vector<8x32xf32>
    %c0_9 = arith.constant 0 : index
    %c0_10 = arith.constant 0 : index
    %10 = vector.load %arg5[%c0_9, %c0_10] : memref<1x32xf32, #tpu.memory_space<vmem>>, vector<1x32xf32>
    %11 = vector.broadcast %10 : vector<1x32xf32> to vector<8x32xf32>
    %12 = arith.addf %9, %11 : vector<8x32xf32>
    %cst_11 = arith.constant 0.000000e+00 : f32
    %13 = vector.broadcast %cst_11 : f32 to vector<8x32xf32>
    %14 = arith.maximumf %12, %13 : vector<8x32xf32>
    %c0_12 = arith.constant 0 : index
    %c0_13 = arith.constant 0 : index
    %15 = vector.load %arg6[%c0_12, %c0_13] : memref<32x128xf32, #tpu.memory_space<vmem>>, vector<32x128xf32>
    %cst_14 = arith.constant dense<0.000000e+00> : vector<8x128xf32>
    %16 = tpu.matmul %14, %15, %cst_14 {dimension_numbers = #tpu.dot_dimension_numbers<[1], [0], [0], [1], [0, 0, 1, 1], [], []>} : vector<8x32xf32>, vector<32x128xf32>, vector<8x128xf32> -> vector<8x128xf32>
    %c0_15 = arith.constant 0 : index
    %c0_16 = arith.constant 0 : index
    %17 = vector.load %arg7[%c0_15, %c0_16] : memref<1x128xf32, #tpu.memory_space<vmem>>, vector<1x128xf32>
    %18 = vector.broadcast %17 : vector<1x128xf32> to vector<8x128xf32>
    %19 = arith.addf %16, %18 : vector<8x128xf32>
    %cst_17 = arith.constant dense<0xFF800000> : vector<8xf32>
    %20 = vector.multi_reduction <maximumf>, %19, %cst_17 [1] : vector<8x128xf32> to vector<8xf32>
    %21 = vector.shape_cast %20 : vector<8xf32> to vector<8x1xf32>
    %22 = vector.broadcast %21 : vector<8x1xf32> to vector<8x128xf32>
    %23 = arith.subf %19, %22 : vector<8x128xf32>
    %24 = math.exp %23 : vector<8x128xf32>
    %cst_18 = arith.constant dense<0.000000e+00> : vector<8xf32>
    %25 = vector.multi_reduction <add>, %24, %cst_18 [1] : vector<8x128xf32> to vector<8xf32>
    %26 = vector.shape_cast %25 : vector<8xf32> to vector<8x1xf32>
    %27 = math.log %26 : vector<8x1xf32>
    %28 = vector.broadcast %27 : vector<8x1xf32> to vector<8x128xf32>
    %29 = arith.subf %23, %28 : vector<8x128xf32>
    %c0_19 = arith.constant 0 : index
    %c0_20 = arith.constant 0 : index
    %30 = vector.load %arg8[%c0_19, %c0_20] : memref<8x128xf32, #tpu.memory_space<vmem>>, vector<8x128xf32>
    tpu.vector_store %arg8[%c0_19, %c0_20], %29 {strides = array<i32>} : memref<8x128xf32, #tpu.memory_space<vmem>>, vector<8x128xf32>,
    return
  }
  func.func @transform_0(%arg0: i32) -> (i32, i32) {
    %c0_i32 = arith.constant 0 : i32
    %c0_i32_0 = arith.constant 0 : i32
    return %arg0, %c0_i32 : i32, i32
  }
  func.func @transform_1(%arg0: i32) -> (i32, i32) {
    %c0_i32 = arith.constant 0 : i32
    %c0_i32_0 = arith.constant 0 : i32
    %c0_i32_1 = arith.constant 0 : i32
    return %c0_i32, %c0_i32_0 : i32, i32
  }
  func.func @transform_2(%arg0: i32) -> (i32, i32) {
    %c0_i32 = arith.constant 0 : i32
    %c0_i32_0 = arith.constant 0 : i32
    %c0_i32_1 = arith.constant 0 : i32
    return %c0_i32, %c0_i32_0 : i32, i32
  }
  func.func @transform_3(%arg0: i32) -> (i32, i32) {
    %c0_i32 = arith.constant 0 : i32
    %c0_i32_0 = arith.constant 0 : i32
    %c0_i32_1 = arith.constant 0 : i32
    return %c0_i32, %c0_i32_0 : i32, i32
  }
  func.func @transform_4(%arg0: i32) -> (i32, i32) {
    %c0_i32 = arith.constant 0 : i32
    %c0_i32_0 = arith.constant 0 : i32
    %c0_i32_1 = arith.constant 0 : i32
    return %c0_i32, %c0_i32_0 : i32, i32
  }
  func.func @transform_5(%arg0: i32) -> (i32, i32) {
    %c0_i32 = arith.constant 0 : i32
    %c0_i32_0 = arith.constant 0 : i32
    %c0_i32_1 = arith.constant 0 : i32
    return %c0_i32, %c0_i32_0 : i32, i32
  }
  func.func @transform_6(%arg0: i32) -> (i32, i32) {
    %c0_i32 = arith.constant 0 : i32
    %c0_i32_0 = arith.constant 0 : i32
    %c0_i32_1 = arith.constant 0 : i32
    return %c0_i32, %c0_i32_0 : i32, i32
  }
  func.func @transform_7(%arg0: i32) -> (i32, i32) {
    %c0_i32 = arith.constant 0 : i32
    %c0_i32_0 = arith.constant 0 : i32
    return %arg0, %c0_i32 : i32, i32
  }
}

</mosaic_0001>

<bundles_post_ra>
// kernel: binarized_mlp_forward.1
= control target key start
LH: loop header
LB: loop body
LE: loop exit
PB: predicated region body
PF: predicated region fallthrough
CT: control target
= control target key end

     0   :  { %v1106_v43 = vmov 0.0   ;;  %vm1107_vm0 = vmmov 0   ;;  %s1373_s0 = inlined_call_operand.vmem [shape: bf16[8,784], index: 0, kind: input, shape index: {}]   ;;  %s1374_s1 = inlined_call_operand.vmem [shape: bf16[784,64], index: 1, kind: input, shape index: {}]   ;;  %s1375_s2 = inlined_call_operand.vmem [shape: f32[1,64], index: 2, kind: input, shape index: {}]   ;;  %s1376_s3 = inlined_call_operand.vmem [shape: f32[64,32], index: 3, kind: input, shape index: {}]   ;;  %s1377_s4 = inlined_call_operand.vmem [shape: f32[1,32], index: 4, kind: input, shape index: {}]   ;;  %s1378_s5 = inlined_call_operand.vmem [shape: f32[32,128], index: 5, kind: input, shape index: {}]   ;;  %s1379_s6 = inlined_call_operand.vmem [shape: f32[1,128], index: 6, kind: input, shape index: {}]   ;;  %s1380_s7 = inlined_call_operand.hbm [shape: f32[8,128], index: 7, kind: output, shape index: {}]  }
   0x1   :  { %v1022_v0 = vld [vmem:[%s1374_s1 + $0x40] sm:$0xff]   ;;  %v1026_v4 = vld [vmem:[%s1374_s1 + $0x48] sm:$0xff]   ;;  %v1030_v8 = vld [vmem:[%s1374_s1 + $0x50] sm:$0xff]  }
   0x2   :  { %v1023_v1 = vld [vmem:[%s1374_s1] sm:$0xff]   ;;  %882 = vmatprep.subr.bf16.mxu0 %v1022_v0  ;;  %v1027_v5 = vld [vmem:[%s1374_s1 + $0x8] sm:$0xff]   ;;  %v1031_v9 = vld [vmem:[%s1374_s1 + $0x10] sm:$0xff]  }
   0x3   :  { %v1024_v2 = vld [vmem:[%s1374_s1 + $0xc0] sm:$0xff]   ;;  %883 = vmatpush3.bf16.msra.mxu0 %v1023_v1  ;;  %v1028_v6 = vld [vmem:[%s1374_s1 + $0xc8] sm:$0xff]   ;;  %v1032_v10 = vld [vmem:[%s1374_s1 + $0xd0] sm:$0xff]  }
   0x4   :  { %v1025_v3 = vld [vmem:[%s1374_s1 + $0x80] sm:$0xff]   ;;  %904 = vmatprep.subr.bf16.mxu1 %v1024_v2  ;;  %884 = vmatprep.subr.bf16.mxu0 %v1026_v4  ;;  %v1029_v7 = vld [vmem:[%s1374_s1 + $0x88] sm:$0xff]   ;;  %v1033_v11 = vld [vmem:[%s1374_s1 + $0x90] sm:$0xff]  }
   0x5   :  { %905 = vmatpush3.bf16.msra.mxu1 %v1025_v3  ;;  %v1034_v12 = vld [vmem:[%s1374_s1 + $0x58] sm:$0xff]   ;;  %v1038_v16 = vld [vmem:[%s1374_s1 + $0x60] sm:$0xff]   ;;  %v1042_v20 = vld [vmem:[%s1374_s1 + $0x68] sm:$0xff]  }
   0x6   :  { %906 = vmatprep.subr.bf16.mxu1 %v1028_v6  ;;  %v1035_v13 = vld [vmem:[%s1374_s1 + $0x18] sm:$0xff]   ;;  %v1039_v17 = vld [vmem:[%s1374_s1 + $0x20] sm:$0xff]   ;;  %v1043_v21 = vld [vmem:[%s1374_s1 + $0x28] sm:$0xff]  }
   0x7   :  { %885 = vmatpush3.bf16.msra.mxu0 %v1027_v5  ;;  %v1036_v14 = vld [vmem:[%s1374_s1 + $0xd8] sm:$0xff]   ;;  %v1040_v18 = vld [vmem:[%s1374_s1 + $0xe0] sm:$0xff]   ;;  %v1044_v22 = vld [vmem:[%s1374_s1 + $0xe8] sm:$0xff]  }
   0x8   :  { %886 = vmatprep.subr.bf16.mxu0 %v1030_v8  ;;  %v1037_v15 = vld [vmem:[%s1374_s1 + $0x98] sm:$0xff]   ;;  %v1041_v19 = vld [vmem:[%s1374_s1 + $0xa0] sm:$0xff]   ;;  %v1045_v23 = vld [vmem:[%s1374_s1 + $0xa8] sm:$0xff]  }
   0x9   :  { %907 = vmatpush3.bf16.msra.mxu1 %v1029_v7  ;;  %v1046_v24 = vld [vmem:[%s1374_s1 + $0x70] sm:$0xff]   ;;  %v1050_v28 = vld [vmem:[%s1374_s1 + $0x78] sm:$0xff]   ;;  %v28_v31 = vld [vmem:[%s1373_s0] sm:$0xff] }
   0xa   :  { %908 = vmatprep.subr.bf16.mxu1 %v1032_v10  ;;  %v1047_v25 = vld [vmem:[%s1374_s1 + $0x30] sm:$0xff]   ;;  %v1051_v29 = vld [vmem:[%s1374_s1 + $0x38] sm:$0xff]   ;;  %v821_v32 = vcombine.low %v28_v31, %v28_v31  ;;  %v822_v33 = vcombine.high %v28_v31, %v28_v31  ;;  %v1056_v35 = vld [vmem:[%s1374_s1 + $0x140] sm:$0xff]  }
   0xb   :  { %887 = vmatpush3.bf16.msra.mxu0 %v1031_v9  ;;  %v1048_v26 = vld [vmem:[%s1374_s1 + $0xf0] sm:$0xff]   ;;  %v1052_v30 = vld [vmem:[%s1374_s1 + $0xf8] sm:$0xff]   ;;  %v29_v36 = vld [vmem:[%s1373_s0 + $0x8] sm:$0xff] }
   0xc   :  { %888 = vmatprep.subr.bf16.mxu0 %v1034_v12  ;;  %v1049_v27 = vld [vmem:[%s1374_s1 + $0xb0] sm:$0xff]   ;;  %v1055_v34 = vld [vmem:[%s1374_s1 + $0xb8] sm:$0xff]   ;;  %491 = vmatprep.mubr.bf16.mxu0 %v822_v33  ;;  %v823_v37 = vcombine.low %v29_v36, %v29_v36  ;;  %v824_v38 = vcombine.high %v29_v36, %v29_v36  ;;  %v1059_v39 = vld [vmem:[%s1374_s1 + $0x100] sm:$0xff]  }
   0xd   :  { %909 = vmatpush3.bf16.msra.mxu1 %v1033_v11  ;;  %v1060_v40 = vld [vmem:[%s1374_s1 + $0x148] sm:$0xff]   ;;  %v1062_v42 = vld [vmem:[%s1374_s1 + $0x150] sm:$0xff]   ;;  %v1064_v45 = vld [vmem:[%s1374_s1 + $0x158] sm:$0xff]  }
   0xe   :  { %910 = vmatprep.subr.bf16.mxu1 %v1036_v14  ;;  %531 = vmatprep.mubr.bf16.mxu1 %v824_v38  ;;  %v1061_v41 = vld [vmem:[%s1374_s1 + $0x108] sm:$0xff]   ;;  %v1063_v44 = vld [vmem:[%s1374_s1 + $0x110] sm:$0xff]   ;;  %v1065_v46 = vld [vmem:[%s1374_s1 + $0x118] sm:$0xff]  }
   0xf   :  { %889 = vmatpush3.bf16.msra.mxu0 %v1035_v13  ;;  %v1066_v47 = vld [vmem:[%s1374_s1 + $0x160] sm:$0xff]   ;;  %v1068_v49 = vld [vmem:[%s1374_s1 + $0x168] sm:$0xff]   ;;  %v30_v51 = vld [vmem:[%s1373_s0 + $0x10] sm:$0xff] }
  0x10   :  { %890 = vmatprep.subr.bf16.mxu0 %v1038_v16  ;;  %v1067_v48 = vld [vmem:[%s1374_s1 + $0x120] sm:$0xff]   ;;  %v826_v52 = vcombine.high %v30_v51, %v30_v51  ;;  %v1077_v53 = vld [vmem:[%s1373_s0 + $0x18] ss:$0 sps:$4 sm:$0xff]  }
  0x11   :  { %911 = vmatpush3.bf16.msra.mxu1 %v1037_v15  ;;  %v1074_v50 = vld [vmem:[%s1374_s1 + $0x180] sm:$0xff]  }
  0x12   :  { %912 = vmatprep.subr.bf16.mxu1 %v1040_v18 }
  0x13   :  { %891 = vmatpush3.bf16.msra.mxu0 %v1039_v17 }
  0x14   :  { %892 = vmatprep.subr.bf16.mxu0 %v1042_v20 }
  0x15   :  { %913 = vmatpush3.bf16.msra.mxu1 %v1041_v19 }
  0x16   :  { %914 = vmatprep.subr.bf16.mxu1 %v1044_v22 }
  0x17   :  { %893 = vmatpush3.bf16.msra.mxu0 %v1043_v21 }
  0x18   :  { %894 = vmatprep.subr.bf16.mxu0 %v1046_v24 }
  0x19   :  { %915 = vmatpush3.bf16.msra.mxu1 %v1045_v23 }
  0x1a   :  { %916 = vmatprep.subr.bf16.mxu1 %v1048_v26 }
  0x1b   :  { %895 = vmatpush3.bf16.msra.mxu0 %v1047_v25 }
  0x1c   :  { %896 = vmatprep.subr.bf16.mxu0 %v1050_v28 }
  0x1d   :  { %917 = vmatpush3.bf16.msra.mxu1 %v1049_v27 }
  0x1e   :  { %918 = vmatprep.subr.bf16.mxu1 %v1052_v30 }
  0x1f   :  { %897 = vmatpush3.bf16.msra.mxu0 %v1051_v29 }
  0x20   :  { %926 = vmatprep.subr.bf16.mxu0 %v1056_v35 }
  0x21   :  { %919 = vmatpush3.bf16.msra.mxu1 %v1055_v34 }
  0x22   :  { %492 = vmatmul.mubr.bf16.vlgmr.msra.gmra.mrb[0].mxu0 %v821_v32  ;;  %964 = vmatprep.subr.bf16.mxu1 %v1106_v43 }
  0x23   :  { %927 = vmatpush3.bf16.msra.mxu0 %v1059_v39 }
  0x24   :  { %532 = vmatmul.mubr.bf16.vlgmr.msra.gmra.mrb[0].mxu1 %v823_v37  ;;  %928 = vmatprep.subr.bf16.mxu0 %v1060_v40 }
  0x25   :  { %966 = vmatprep.mubr.msk.bf16.mxu1 %vm1107_vm0, %v1106_v43 }
  0x27   :  { %929 = vmatpush3.bf16.msra.mxu0 %v1061_v41 }
  0x28   :  { %930 = vmatprep.subr.bf16.mxu0 %v1062_v42 }
  0x2b   :  { %931 = vmatpush3.bf16.msra.mxu0 %v1063_v44 }
  0x2c   :  { %932 = vmatprep.subr.bf16.mxu0 %v1064_v45 }
  0x2f   :  { %933 = vmatpush3.bf16.msra.mxu0 %v1065_v46 }
  0x30   :  { %934 = vmatprep.subr.bf16.mxu0 %v1066_v47 }
  0x31   :  { %12 = vsyncpa [#allocation3], 0  ;;  %965 = vmatpush3.bf16.msra.mxu1 %v1074_v50  ;;  %vm455_vm1 = vcmask 130048   ;;  %v1069_v54 = vld [vmem:[%s1374_s1 + $0x128] sm:$0xff]   ;;  %571 = vmatprep.mubr.bf16.mxu0 %v826_v52  ;;  %v1070_v55 = vld [vmem:[%s1374_s1 + $0x170] sm:$0xff]   ;;  %v825_v59 = vcombine.low %v30_v51, %v30_v51  ;;  %v1108_v63 = vmov 0.0|0.0  }
  0x32   :  { %v1071_v56 = vld [vmem:[%s1374_s1 + $0x130] sm:$0xff]   ;;  %v1072_v57 = vld [vmem:[%s1374_s1 + $0x178] sm:$0xff]   ;;  %v620_v60 = vld [vmem:[%s1376_s3] sm:$0xff]  ;;  %1000 = vmatprep.subr.bf16.mxu1 %v1108_v63  ;;  %vm635_vm2 = vcmask 523264   ;;  %vm721_vm3 = vcmask 261120  }
  0x33   :  { %935 = vmatpush3.bf16.msra.mxu0 %v1067_v48  ;;  %v1073_v58 = vld [vmem:[%s1374_s1 + $0x138] sm:$0xff]   ;;  %v621_v61 = vld [vmem:[%s1376_s3 + $0x8] sm:$0xff]  ;;  %v622_v62 = vld [vmem:[%s1376_s3 + $0x10] sm:$0xff] }
  0x34   :  { %936 = vmatprep.subr.bf16.mxu0 %v1068_v49  ;;  %967 = vmatmul.mubr.msk.bf16.vlgmr.msra.gmra.mrb[4].mxu1 %vm455_vm1, %v1077_v53  ;;  %v1001_v0 = vpack.c.bf16 %v621_v61, %v620_v60  ;;  %v623_v1 = vld [vmem:[%s1376_s3 + $0x18] sm:$0xff]  ;;  %v624_v3 = vld [vmem:[%s1376_s3 + $0x20] sm:$0xff]  ;;  %v625_v4 = vld [vmem:[%s1376_s3 + $0x28] sm:$0xff] }
  0x35   :  { %986 = vmatprep.mubr.msk.f32.mxu1 %vm1107_vm0, %v1106_v43  ;;  %v1004_v2 = vpack.c.bf16 %v623_v1, %v622_v62  ;;  %v1007_v5 = vpack.c.bf16 %v625_v4, %v624_v3  ;;  %v626_v6 = vld [vmem:[%s1376_s3 + $0x30] sm:$0xff]  ;;  %v627_v7 = vld [vmem:[%s1376_s3 + $0x38] sm:$0xff]  ;;  %v820_v10 = vld [vmem:[%s1375_s2] ss:$0 sm:$0xff] }
  0x36   :  { %1002 = vmatpush3.bf16.msra.mxu1 %v1001_v0  ;;  %v1010_v8 = vpack.c.bf16 %v627_v7, %v626_v6  ;;  %v710_v32 = vld [vmem:[%s1378_s5] sm:$0xff]  ;;  %v711_v33 = vld [vmem:[%s1378_s5 + $0x8] sm:$0xff]  ;;  %v712_v37 = vld [vmem:[%s1378_s5 + $0x10] sm:$0xff] }
  0x37   :  { %937 = vmatpush3.bf16.msra.mxu0 %v1069_v54  ;;  %1003 = vmatprep.subr.bf16.mxu1 %v1108_v63  ;;  %v1013_v35 = vpack.c.bf16 %v711_v33, %v710_v32  ;;  %v713_v38 = vld [vmem:[%s1378_s5 + $0x18] sm:$0xff]  ;;  %v878_v40 = vld [vmem:[%s1377_s4] ss:$0 sm:$0xff]  ;;  %s1109_s4 = smov [#allocation2]  }
  0x38   :  { %938 = vmatprep.subr.bf16.mxu0 %v1070_v55  ;;  %v1016_v39 = vpack.c.bf16 %v713_v38, %v712_v37  ;;  %v880_v45 = vld [vmem:[%s1379_s6] ss:$0 sm:$0xff]  ;;  %s812_s5 = sshll.u32 %s1109_s4, 4  ;;  %s813_s5 = int_to_ptr.vmem [resolvable:$true] %s812_s5 }
  0x39   :  { %s1082_s6 = scalar_lea.vmem %s813_s5, 128  ;;  %p1087_p1 = scmp.lt.s32.totalorder %s813_s5, %s813_s5 }
  0x3a   :  { %1005 = vmatpush3.bf16.msra.mxu1 %v1004_v2  ;;  %p1083_p0 = scmp.ne.s32.totalorder %s813_s5, %s1082_s6  ;;  %p1088_p2 = scmp.lt.s32.totalorder %s1082_s6, %s1082_s6 }
  0x3b   :  { %939 = vmatpush3.bf16.msra.mxu0 %v1071_v56  ;;  %1006 = vmatprep.subr.bf16.mxu1 %v1108_v63 }
  0x3c   :  { %940 = vmatprep.subr.bf16.mxu0 %v1072_v57  ;;  %p1089_p3 = por %p1088_p2, %p1087_p1 }
  0x3e   :  { %1008 = vmatpush3.bf16.msra.mxu1 %v1007_v5  ;;  %p1090_p4 = pnand %p1089_p3, %p1083_p0 }
  0x3f   :  { %941 = vmatpush3.bf16.msra.mxu0 %v1073_v58  ;;  %1009 = vmatprep.subr.bf16.mxu1 %v1108_v63 }
  0x42   :  { %572 = vmatmul.mubr.bf16.vlgmr.msra.gmra.mrb[4].mxu0 %v825_v59  ;;  %1011 = vmatpush3.bf16.msra.mxu1 %v1010_v8 }
  0x43   :  { %1012 = vmatprep.subr.bf16.mxu1 %v1108_v63 }
  0xf5   :  { %v898_v9 = vpop.f32.mrb[0].mxu0 }
  0xf6   :  { %v899_v11 = vpop.f32.mrb[1].mxu0 }
  0xf7   :  { %v900_v12 = vadd.f32 %v899_v11, %v898_v9  ;;  %v901_v13 = vpop.f32.mrb[2].mxu0  ;;  %v920_v14 = vpop.f32.mrb[0].mxu1 }
  0xf8   :  { %v902_v15 = vpop.f32.mrb[3].mxu0  ;;  %v921_v16 = vpop.f32.mrb[1].mxu1 }
  0xf9   :  { %v494_v17 = vadd.f32 %v900_v12, %v820_v10  ;;  %v922_v18 = vadd.f32 %v921_v16, %v920_v14  ;;  %v923_v19 = vpop.f32.mrb[2].mxu1 }
  0xfa   :  { %v924_v20 = vpop.f32.mrb[3].mxu1 }
  0xfb   :  { %v534_v21 = vadd.f32 %v922_v18, %v494_v17 }
 0x107   :  { %v613_v22 = vpop.f32.mrb[4].mxu1 }
 0x108   :  { %v968_v23 = vpop.f32.mrb[5].mxu1 }
 0x109   :  { %v616_v24 = vpop.f32.mrb[6].mxu1 }
 0x10a   :  { %v969_v25 = vpop.f32.mrb[7].mxu1 }
 0x115   :  { %v942_v26 = vpop.f32.mrb[4].mxu0 }
 0x116   :  { %v943_v27 = vpop.f32.mrb[5].mxu0 }
 0x117   :  { %v944_v28 = vadd.f32 %v943_v27, %v942_v26  ;;  %v945_v29 = vpop.f32.mrb[6].mxu0 }
 0x118   :  { %v946_v30 = vpop.f32.mrb[7].mxu0 }
 0x119   :  { %v574_v31 = vadd.f32 %v944_v28, %v534_v21 }
 0x11b   :  { %v614_v34 = vadd.f32 %v613_v22, %v574_v31 }
 0x11d   :  { %v619_v36 = vmax.f32 %v614_v34, 0.0 }
 0x11f   :  { %987 = vmatmul.mubr.msk.f32.vlgmr.msra.gmra.mrb[8].mxu1 %vm635_vm2, %v619_v36 }
 0x120   :  { %1014 = vmatpush3.bf16.msra.mxu1 %v1013_v35  ;;  %997 = vmatprep.mubr.msk.f32.mxu1 %vm1107_vm0, %v1106_v43 }
 0x121   :  { %1015 = vmatprep.subr.bf16.mxu1 %v1108_v63 }
 0x124   :  { %1017 = vmatpush3.bf16.msra.mxu1 %v1016_v39 }
 0x1f2   :  { %v705_v41 = vpop.f32.mrb[8].mxu1 }
 0x1f3   :  { %v706_v42 = vadd.f32 %v878_v40, %v705_v41  ;;  %v988_v44 = vpop.f32.mrb[9].mxu1 }
 0x1f5   :  { %v709_v43 = vmax.f32 %v706_v42, 0.0 }
 0x1f7   :  { %998 = vmatmul.mubr.msk.f32.vlgmr.msra.gmra.mrb[10].mxu1 %vm721_vm3, %v709_v43 }
 0x2ca   :  { %v791_v46 = vpop.f32.mrb[10].mxu1 }
 0x2cb   :  { %v792_v47 = vadd.f32 %v880_v45, %v791_v46  ;;  %v999_v48 = vpop.f32.mrb[11].mxu1 }
 0x2cd   :  { %795 = vmax.xlane.f32.xlu0 %v792_v47 }
 0x35a   :  { %v796_v49 = vpop.xlane.xlu0 %795 }
 0x35b   :  { %v797_v50 = vsub.f32 %v792_v47, %v796_v49 }
 0x35d   :  { %v798_v51 = vmul.f32 1.442695, %v797_v50 }
 0x35f   :  { %1078 = vpow2.f32 %v798_v51 }
 0x369   :  { %v1079_v52 = vpop.eup %1078 }
 0x36a   :  { %800 = vadd.xlane.f32.xlu0 %v1079_v52 }
 0x3f7   :  { %v801_v53 = vpop.xlane.xlu0 %800 }
 0x3f8   :  { %1080 = vlog2.f32 %v801_v53 }
 0x402   :  { %v1081_v54 = vpop.eup %1080 }
 0x403   :  { %v803_v55 = vmul.f32 0.6931472, %v1081_v54 }
 0x405   :  { %v804_v56 = vsub.f32 %v797_v50, %v803_v55 }
 0x407   :  { %805 = vst [vmem:[#allocation2] sm:$0xff] %v804_v56 }
 0x408   :  { %1093 = shalt.err (!%p1090_p4)
}
 0x409   :  { %s1094_s19 = scalar_lea.hbm %s1380_s7, 128 }
 0x40a   :  { %p1095_p5 = scmp.ne.s32.totalorder %s1380_s7, %s1094_s19  ;;  %p1098_p6 = scmp.lt.u32.totalorder %s1094_s19, %s1380_s7 }
 0x40c   :  { %p1100_p7 = pnand %p1098_p6, %p1095_p5 }
 0x40e   :  { %1103 = shalt.err (!%p1100_p7)
}
 0x40f   :  { %815 = dma.vmem_to_hbm [thread:$0]  %s813_s5, 128, %s1380_s7, [#allocation3]  }
 0x410   :  { %1104 = dma.done.wait [#allocation3], 128  }
 0x411   :  { %1105 = vsyncadd [#allocation3], 4294967168 }
 0x412   :  { %819 = vsyncpa [#allocation3], 1 }

</bundles_post_ra>
